<compile_context>
chip_gen: v7x
topology: tpu7x:2x2x1
jax: 0.10.0
libtpu: 0.0.40
codegen_flags: <defaults>
</compile_context>

<pallas_src>
import jax
import jax.numpy as jnp
from jax.experimental import pallas as pl
from jax.experimental.pallas import tpu as pltpu


# ----------------------------------------------------------------------------
# Kernel
# ----------------------------------------------------------------------------
def twinq_kernel(state_ref, action_ref,
                 w1s_ref, w1a_ref, b1_ref,
                 w2_ref, b2_ref,
                 w3_ref, b3_ref,
                 out_ref):
    cdt = w1s_ref.dtype  # MXU operand dtype (bf16 in production, f32 for checks)

    s = state_ref[...].astype(cdt)
    a = action_ref[...].astype(cdt)

    # Layer 1: both nets fused along N; K split over state/action so the wrapper
    # never materializes concat([state, action]) in HBM.
    h = jnp.dot(s, w1s_ref[...], preferred_element_type=jnp.float32)
    h = h + jnp.dot(a, w1a_ref[...], preferred_element_type=jnp.float32)
    h = jnp.maximum(h + b1_ref[...], 0.0)                        # (TB, 2H) f32
    hc = h.astype(cdt)

    b2 = b2_ref[...]
    w3 = w3_ref[...]
    if len(w2_ref.shape) == 2:
        # Small hidden dims (2H <= MXU native width): block-diagonal fused
        # [2H, 2H] weight -> one MXU pass for both nets.
        h2 = jnp.dot(hc, w2_ref[...], preferred_element_type=jnp.float32)
        h2 = jnp.maximum(h2 + b2, 0.0)                           # (TB, 2H) f32
        q = jnp.dot(h2.astype(cdt), w3, preferred_element_type=jnp.float32)
    else:
        # Large hidden dims: two HxH matmuls on static, 128-aligned lane slices
        # (skips the zero blocks of the block-diagonal fusion).
        H = w2_ref.shape[-1]
        h2a = jnp.maximum(
            jnp.dot(hc[:, :H], w2_ref[0], preferred_element_type=jnp.float32)
            + b2[:, :H], 0.0)
        h2b = jnp.maximum(
            jnp.dot(hc[:, H:], w2_ref[1], preferred_element_type=jnp.float32)
            + b2[:, H:], 0.0)
        # w3 is block-structured [[w3_q1, 0], [0, w3_q2]], so the two partial
        # products land in disjoint output columns and just add.
        q = (jnp.dot(h2a.astype(cdt), w3[:H, :], preferred_element_type=jnp.float32)
             + jnp.dot(h2b.astype(cdt), w3[H:, :], preferred_element_type=jnp.float32))
    q = q + b3_ref[...]                                          # (TB, 2) f32

    # min over the two heads, relaid out lane-dense: (TB, 2) -> (2, TB) -> (1, TB).
    qt = q.T
    out_ref[0] = jnp.minimum(qt[0:1, :], qt[1:2, :])


# ----------------------------------------------------------------------------
# Wrapper
# ----------------------------------------------------------------------------
_DEF_VMEM_LIMIT = 48 * 1024 * 1024      # above scoped defaults, below v7x physical
_single_buffer_weights = True           # flipped off if Buffered(1) is rejected


def _pick_batch_tile(batch, tile_b):
    """Pick a batch tile: as large as allowed, but >= 2 grid steps for big B."""
    tb = batch if batch <= tile_b else tile_b
    if batch >= 512 and pl.cdiv(batch, tb) < 2:
        # Keep both v7x TensorCores busy (grid axis is the only megacore lever).
        tb = ((batch + 1) // 2 + 127) // 128 * 128
    return tb


def twinq_forward(state, action, fused, *, tile_b=2048,
                  vmem_limit_bytes=_DEF_VMEM_LIMIT):
    """TwinQ forward: min(q1(state, action), q2(state, action)) -> [batch].

    state/action may already be bf16 (halves input DMA); the kernel casts to the
    weights' compute dtype in-VMEM, so no wrapper-side astype is ever added.
    """
    global _single_buffer_weights
    B, state_dim = state.shape
    action_dim = action.shape[1]

    tb = _pick_batch_tile(B, tile_b)
    num_tiles = pl.cdiv(B, tb)

    def run(weight_mode):
        def resident(x):  # weights/biases: same block every step -> VMEM-resident
            if weight_mode is None:
                return pl.BlockSpec(x.shape, lambda i: (0,) * x.ndim)
            return pl.BlockSpec(x.shape, lambda i: (0,) * x.ndim,
                                pipeline_mode=weight_mode)

        return pl.pallas_call(
            twinq_kernel,
            # Lane-dense output: one (1, tb) row per grid step; last two block
            # dims equal the full array dims, so no masked 1-lane stores.
            out_shape=jax.ShapeDtypeStruct((num_tiles, 1, tb), jnp.float32),
            grid=(num_tiles,),
            in_specs=[
                pl.BlockSpec((tb, state_dim), lambda i: (i, 0)),
                pl.BlockSpec((tb, action_dim), lambda i: (i, 0)),
                resident(fused["w1_state"]),
                resident(fused["w1_action"]),
                resident(fused["b1"]),
                resident(fused["w2"]),
                resident(fused["b2"]),
                resident(fused["w3"]),
                resident(fused["b3"]),
            ],
            out_specs=pl.BlockSpec((1, 1, tb), lambda i: (i, 0, 0)),
            compiler_params=pltpu.CompilerParams(
                dimension_semantics=("parallel",),      # megacore sharding on v7x
                vmem_limit_bytes=vmem_limit_bytes),
        )(state, action,
          fused["w1_state"], fused["w1_action"], fused["b1"],
          fused["w2"], fused["b2"],
          fused["w3"], fused["b3"])

    if _single_buffer_weights:
        try:
            out = run(pl.Buffered(1))   # constant-index blocks: single buffer
        except Exception:
            _single_buffer_weights = False
            out = run(None)
    else:
        out = run(None)

    return out.reshape(-1)[:B]          # free reshape + slice -> [B]


# ----------------------------------------------------------------------------
# Parameter handling
# ----------------------------------------------------------------------------
def init_params(key, state_dim, action_dim, hidden_dim):
    """Per-network params, PyTorch-Linear-like uniform init; weights [in, out]."""
    in_dim = state_dim + action_dim
    dims = [in_dim, hidden_dim, hidden_dim, 1]
    params = {}
    for net in ("a", "b"):
        for li in range(3):
            fan_in, fan_out = dims[li], dims[li + 1]
            key, kw, kb = jax.random.split(key, 3)
            bound = 1.0 / jnp.sqrt(fan_in)
            params[f"w{li + 1}{net}"] = jax.random.uniform(
                kw, (fan_in, fan_out), jnp.float32, -bound, bound)
            # biases 2D [1, fan_out] for a clean (sublane, lane) layout
            params[f"b{li + 1}{net}"] = jax.random.uniform(
                kb, (1, fan_out), jnp.float32, -bound, bound)
    return params


def fuse_params(params, state_dim, compute_dtype=jnp.bfloat16,
                fuse_layer2=None, fused_width_limit=256):
    """Fuse the twin Q-networks into wide weight matrices (built once, offline).

    Layer-2 block-diagonal fusion is gated on hidden size: it is free while
    2H <= fused_width_limit (256 on v6e/v7x, use 128 on v5e); above that the
    zero blocks would double the MXU pushes, so the kernel instead gets the two
    HxH weights stacked as [2, H, H] and runs two matmuls on lane slices.
    """
    H = params["w2a"].shape[0]
    if fuse_layer2 is None:
        fuse_layer2 = (2 * H) <= fused_width_limit

    w1 = jnp.concatenate([params["w1a"], params["w1b"]], axis=1)       # [in, 2H]
    w1_state, w1_action = w1[:state_dim], w1[state_dim:]

    if fuse_layer2:
        zeros = jnp.zeros((H, H), params["w2a"].dtype)
        w2 = jnp.block([[params["w2a"], zeros],
                        [zeros, params["w2b"]]])                       # [2H, 2H]
    else:
        w2 = jnp.stack([params["w2a"], params["w2b"]])                 # [2, H, H]

    w3 = jnp.concatenate([
        jnp.concatenate([params["w3a"], jnp.zeros_like(params["w3a"])], axis=1),
        jnp.concatenate([jnp.zeros_like(params["w3b"]), params["w3b"]], axis=1),
    ], axis=0)                                                         # [2H, 2]

    return {
        "w1_state": w1_state.astype(compute_dtype),
        "w1_action": w1_action.astype(compute_dtype),
        "w2": w2.astype(compute_dtype),
        "w3": w3.astype(compute_dtype),
        "b1": jnp.concatenate([params["b1a"], params["b1b"]], 1).astype(jnp.float32),
        "b2": jnp.concatenate([params["b2a"], params["b2b"]], 1).astype(jnp.float32),
        "b3": jnp.concatenate([params["b3a"], params["b3b"]], 1).astype(jnp.float32),
    }


# ----------------------------------------------------------------------------
# Pure-JAX reference (mirrors the PyTorch module exactly, unfused, f32)
# ----------------------------------------------------------------------------
def twinq_reference(state, action, params):
    sa = jnp.concatenate([state, action], axis=1)

    def mlp(net):
        h = jnp.maximum(sa @ params[f"w1{net}"] + params[f"b1{net}"], 0.0)
        h = jnp.maximum(h @ params[f"w2{net}"] + params[f"b2{net}"], 0.0)
        return (h @ params[f"w3{net}"] + params[f"b3{net}"])[:, 0]

    return jnp.minimum(mlp("a"), mlp("b"))


# ----------------------------------------------------------------------------
# Demo / self-check
# ----------------------------------------------------------------------------
if __name__ == "__main__":
    batch, state_dim, action_dim, hidden_dim = 8, 12, 4, 32

    key = jax.random.PRNGKey(0)
    k_state, k_action, k_p1, k_p2 = jax.random.split(key, 4)
    state = jax.random.normal(k_state, (batch, state_dim), jnp.float32)
    action = jax.random.normal(k_action, (batch, action_dim), jnp.float32)

    # --- small hidden dim: fused block-diagonal layer-2 path ------------------
    params = init_params(k_p1, state_dim, action_dim, hidden_dim)
    ref = jax.block_until_ready(twinq_reference(state, action, params))

    # f32 MXU operands (tolerance covers MXU matmul-pass/precision differences
    # vs. the XLA reference dot).
    fused_f32 = fuse_params(params, state_dim, compute_dtype=jnp.float32)
    out_f32 = jax.block_until_ready(twinq_forward(state, action, fused_f32))
    assert out_f32.shape == (batch,), out_f32.shape
    assert bool(jnp.allclose(out_f32, ref, atol=2e-2, rtol=2e-2)), (out_f32, ref)

    # production path: bf16 MXU operands, f32 accumulation (v5e/v6e/v7x).
    # Note: bf16 can flip which head wins the min when q1 ~= q2 (within tol).
    fused_bf16 = fuse_params(params, state_dim, compute_dtype=jnp.bfloat16)
    out_bf16 = jax.block_until_ready(twinq_forward(state, action, fused_bf16))
    assert out_bf16.shape == (batch,), out_bf16.shape
    assert bool(jnp.allclose(out_bf16, ref, atol=5e-2, rtol=5e-2)), (out_bf16, ref)

    # --- larger hidden dim: un-fused (two HxH matmuls) layer-2 path -----------
    params_big = init_params(k_p2, state_dim, action_dim, 128)
    ref_big = jax.block_until_ready(twinq_reference(state, action, params_big))
    fused_unf = fuse_params(params_big, state_dim, compute_dtype=jnp.float32,
                            fuse_layer2=False)
    out_big = jax.block_until_ready(twinq_forward(state, action, fused_unf))
    assert out_big.shape == (batch,), out_big.shape
    assert bool(jnp.allclose(out_big, ref_big, atol=2e-2, rtol=2e-2)), (out_big, ref_big)

    print("KERNEL_OK")
</pallas_src>

<mosaic_0001>
module attributes {stable_mosaic.version = 11 : i64} {
  func.func @twinq_kernel(%arg0: i32, %arg1: memref<8x12xf32, #tpu.memory_space<vmem>>, %arg2: memref<8x4xf32, #tpu.memory_space<vmem>>, %arg3: memref<12x64xf32, #tpu.memory_space<vmem>>, %arg4: memref<4x64xf32, #tpu.memory_space<vmem>>, %arg5: memref<1x64xf32, #tpu.memory_space<vmem>>, %arg6: memref<64x64xf32, #tpu.memory_space<vmem>>, %arg7: memref<1x64xf32, #tpu.memory_space<vmem>>, %arg8: memref<64x2xf32, #tpu.memory_space<vmem>>, %arg9: memref<1x2xf32, #tpu.memory_space<vmem>>, %arg10: memref<1x1x8xf32, #tpu.memory_space<vmem>>) attributes {dimension_semantics = [#tpu.dimension_semantics<parallel>], iteration_bounds = array<i64: 1>, scalar_prefetch = 0 : i64, scratch_operands = 0 : i64, tpu.core_type = #tpu.core_type<tc>, window_params = [{transform_indices = @transform_0, window_bounds = array<i64: 8, 12>}, {transform_indices = @transform_1, window_bounds = array<i64: 8, 4>}, {pipeline_mode = #tpu.pipeline_mode<synchronous>, transform_indices = @transform_2, window_bounds = array<i64: 12, 64>}, {pipeline_mode = #tpu.pipeline_mode<synchronous>, transform_indices = @transform_3, window_bounds = array<i64: 4, 64>}, {pipeline_mode = #tpu.pipeline_mode<synchronous>, transform_indices = @transform_4, window_bounds = array<i64: 1, 64>}, {pipeline_mode = #tpu.pipeline_mode<synchronous>, transform_indices = @transform_5, window_bounds = array<i64: 64, 64>}, {pipeline_mode = #tpu.pipeline_mode<synchronous>, transform_indices = @transform_6, window_bounds = array<i64: 1, 64>}, {pipeline_mode = #tpu.pipeline_mode<synchronous>, transform_indices = @transform_7, window_bounds = array<i64: 64, 2>}, {pipeline_mode = #tpu.pipeline_mode<synchronous>, transform_indices = @transform_8, window_bounds = array<i64: 1, 2>}, {transform_indices = @transform_9, window_bounds = array<i64: 1, 1, 8>}]} {
    %c0 = arith.constant 0 : index
    %c0_0 = arith.constant 0 : index
    %0 = vector.load %arg1[%c0, %c0_0] : memref<8x12xf32, #tpu.memory_space<vmem>>, vector<8x12xf32>
    %c0_1 = arith.constant 0 : index
    %c0_2 = arith.constant 0 : index
    %1 = vector.load %arg2[%c0_1, %c0_2] : memref<8x4xf32, #tpu.memory_space<vmem>>, vector<8x4xf32>
    %c0_3 = arith.constant 0 : index
    %c0_4 = arith.constant 0 : index
    %2 = vector.load %arg3[%c0_3, %c0_4] : memref<12x64xf32, #tpu.memory_space<vmem>>, vector<12x64xf32>
    %cst = arith.constant dense<0.000000e+00> : vector<8x64xf32>
    %3 = tpu.matmul %0, %2, %cst {dimension_numbers = #tpu.dot_dimension_numbers<[1], [0], [0], [1], [0, 0, 1, 1], [], []>} : vector<8x12xf32>, vector<12x64xf32>, vector<8x64xf32> -> vector<8x64xf32>
    %c0_5 = arith.constant 0 : index
    %c0_6 = arith.constant 0 : index
    %4 = vector.load %arg4[%c0_5, %c0_6] : memref<4x64xf32, #tpu.memory_space<vmem>>, vector<4x64xf32>
    %cst_7 = arith.constant dense<0.000000e+00> : vector<8x64xf32>
    %5 = tpu.matmul %1, %4, %cst_7 {dimension_numbers = #tpu.dot_dimension_numbers<[1], [0], [0], [1], [0, 0, 1, 1], [], []>} : vector<8x4xf32>, vector<4x64xf32>, vector<8x64xf32> -> vector<8x64xf32>
    %6 = arith.addf %3, %5 : vector<8x64xf32>
    %c0_8 = arith.constant 0 : index
    %c0_9 = arith.constant 0 : index
    %7 = vector.load %arg5[%c0_8, %c0_9] : memref<1x64xf32, #tpu.memory_space<vmem>>, vector<1x64xf32>
    %8 = vector.broadcast %7 : vector<1x64xf32> to vector<8x64xf32>
    %9 = arith.addf %6, %8 : vector<8x64xf32>
    %cst_10 = arith.constant 0.000000e+00 : f32
    %10 = vector.broadcast %cst_10 : f32 to vector<8x64xf32>
    %11 = arith.maximumf %9, %10 : vector<8x64xf32>
    %c0_11 = arith.constant 0 : index
    %c0_12 = arith.constant 0 : index
    %12 = vector.load %arg7[%c0_11, %c0_12] : memref<1x64xf32, #tpu.memory_space<vmem>>, vector<1x64xf32>
    %c0_13 = arith.constant 0 : index
    %c0_14 = arith.constant 0 : index
    %13 = vector.load %arg8[%c0_13, %c0_14] : memref<64x2xf32, #tpu.memory_space<vmem>>, vector<64x2xf32>
    %c0_15 = arith.constant 0 : index
    %c0_16 = arith.constant 0 : index
    %14 = vector.load %arg6[%c0_15, %c0_16] : memref<64x64xf32, #tpu.memory_space<vmem>>, vector<64x64xf32>
    %cst_17 = arith.constant dense<0.000000e+00> : vector<8x64xf32>
    %15 = tpu.matmul %11, %14, %cst_17 {dimension_numbers = #tpu.dot_dimension_numbers<[1], [0], [0], [1], [0, 0, 1, 1], [], []>} : vector<8x64xf32>, vector<64x64xf32>, vector<8x64xf32> -> vector<8x64xf32>
    %16 = vector.broadcast %12 : vector<1x64xf32> to vector<8x64xf32>
    %17 = arith.addf %15, %16 : vector<8x64xf32>
    %cst_18 = arith.constant 0.000000e+00 : f32
    %18 = vector.broadcast %cst_18 : f32 to vector<8x64xf32>
    %19 = arith.maximumf %17, %18 : vector<8x64xf32>
    %cst_19 = arith.constant dense<0.000000e+00> : vector<8x2xf32>
    %20 = tpu.matmul %19, %13, %cst_19 {dimension_numbers = #tpu.dot_dimension_numbers<[1], [0], [0], [1], [0, 0, 1, 1], [], []>} : vector<8x64xf32>, vector<64x2xf32>, vector<8x2xf32> -> vector<8x2xf32>
    %c0_20 = arith.constant 0 : index
    %c0_21 = arith.constant 0 : index
    %21 = vector.load %arg9[%c0_20, %c0_21] : memref<1x2xf32, #tpu.memory_space<vmem>>, vector<1x2xf32>
    %22 = vector.broadcast %21 : vector<1x2xf32> to vector<8x2xf32>
    %23 = arith.addf %20, %22 : vector<8x2xf32>
    %24 = tpu.transpose %23, [1, 0] : vector<8x2xf32> -> vector<2x8xf32>
    %25 = vector.extract_strided_slice %24 {offsets = [0, 0], sizes = [1, 8], strides = [1, 1]} : vector<2x8xf32> to vector<1x8xf32>
    %26 = vector.extract_strided_slice %24 {offsets = [1, 0], sizes = [1, 8], strides = [1, 1]} : vector<2x8xf32> to vector<1x8xf32>
    %27 = arith.minimumf %25, %26 : vector<1x8xf32>
    %c0_22 = arith.constant 0 : index
    %c0_23 = arith.constant 0 : index
    %c0_24 = arith.constant 0 : index
    %28 = vector.load %arg10[%c0_22, %c0_23, %c0_24] : memref<1x1x8xf32, #tpu.memory_space<vmem>>, vector<1x1x8xf32>
    %29 = vector.shape_cast %28 : vector<1x1x8xf32> to vector<1x8xf32>
    %30 = vector.shape_cast %27 : vector<1x8xf32> to vector<1x1x8xf32>
    tpu.vector_store %arg10[%c0_22, %c0_23, %c0_24], %30 {strides = array<i32>} : memref<1x1x8xf32, #tpu.memory_space<vmem>>, vector<1x1x8xf32>,
    return
  }
  func.func @transform_0(%arg0: i32) -> (i32, i32) {
    %c0_i32 = arith.constant 0 : i32
    %c0_i32_0 = arith.constant 0 : i32
    return %arg0, %c0_i32 : i32, i32
  }
  func.func @transform_1(%arg0: i32) -> (i32, i32) {
    %c0_i32 = arith.constant 0 : i32
    %c0_i32_0 = arith.constant 0 : i32
    return %arg0, %c0_i32 : i32, i32
  }
  func.func @transform_2(%arg0: i32) -> (i32, i32) {
    %c0_i32 = arith.constant 0 : i32
    %c0_i32_0 = arith.constant 0 : i32
    %c0_i32_1 = arith.constant 0 : i32
    return %c0_i32, %c0_i32_0 : i32, i32
  }
  func.func @transform_3(%arg0: i32) -> (i32, i32) {
    %c0_i32 = arith.constant 0 : i32
    %c0_i32_0 = arith.constant 0 : i32
    %c0_i32_1 = arith.constant 0 : i32
    return %c0_i32, %c0_i32_0 : i32, i32
  }
  func.func @transform_4(%arg0: i32) -> (i32, i32) {
    %c0_i32 = arith.constant 0 : i32
    %c0_i32_0 = arith.constant 0 : i32
    %c0_i32_1 = arith.constant 0 : i32
    return %c0_i32, %c0_i32_0 : i32, i32
  }
  func.func @transform_5(%arg0: i32) -> (i32, i32) {
    %c0_i32 = arith.constant 0 : i32
    %c0_i32_0 = arith.constant 0 : i32
    %c0_i32_1 = arith.constant 0 : i32
    return %c0_i32, %c0_i32_0 : i32, i32
  }
  func.func @transform_6(%arg0: i32) -> (i32, i32) {
    %c0_i32 = arith.constant 0 : i32
    %c0_i32_0 = arith.constant 0 : i32
    %c0_i32_1 = arith.constant 0 : i32
    return %c0_i32, %c0_i32_0 : i32, i32
  }
  func.func @transform_7(%arg0: i32) -> (i32, i32) {
    %c0_i32 = arith.constant 0 : i32
    %c0_i32_0 = arith.constant 0 : i32
    %c0_i32_1 = arith.constant 0 : i32
    return %c0_i32, %c0_i32_0 : i32, i32
  }
  func.func @transform_8(%arg0: i32) -> (i32, i32) {
    %c0_i32 = arith.constant 0 : i32
    %c0_i32_0 = arith.constant 0 : i32
    %c0_i32_1 = arith.constant 0 : i32
    return %c0_i32, %c0_i32_0 : i32, i32
  }
  func.func @transform_9(%arg0: i32) -> (i32, i32, i32) {
    %c0_i32 = arith.constant 0 : i32
    %c0_i32_0 = arith.constant 0 : i32
    %c0_i32_1 = arith.constant 0 : i32
    return %arg0, %c0_i32, %c0_i32_0 : i32, i32, i32
  }
}

module attributes {stable_mosaic.version = 11 : i64} {
  func.func @twinq_kernel(%arg0: i32, %arg1: memref<8x12xf32, #tpu.memory_space<vmem>>, %arg2: memref<8x4xf32, #tpu.memory_space<vmem>>, %arg3: memref<12x64xf32, #tpu.memory_space<vmem>>, %arg4: memref<4x64xf32, #tpu.memory_space<vmem>>, %arg5: memref<1x64xf32, #tpu.memory_space<vmem>>, %arg6: memref<64x64xf32, #tpu.memory_space<vmem>>, %arg7: memref<1x64xf32, #tpu.memory_space<vmem>>, %arg8: memref<64x2xf32, #tpu.memory_space<vmem>>, %arg9: memref<1x2xf32, #tpu.memory_space<vmem>>, %arg10: memref<1x1x8xf32, #tpu.memory_space<vmem>>) attributes {dimension_semantics = [#tpu.dimension_semantics<parallel>], iteration_bounds = array<i64: 1>, scalar_prefetch = 0 : i64, scratch_operands = 0 : i64, tpu.core_type = #tpu.core_type<tc>, window_params = [{transform_indices = @transform_0, window_bounds = array<i64: 8, 12>}, {transform_indices = @transform_1, window_bounds = array<i64: 8, 4>}, {pipeline_mode = #tpu.pipeline_mode<synchronous>, transform_indices = @transform_2, window_bounds = array<i64: 12, 64>}, {pipeline_mode = #tpu.pipeline_mode<synchronous>, transform_indices = @transform_3, window_bounds = array<i64: 4, 64>}, {pipeline_mode = #tpu.pipeline_mode<synchronous>, transform_indices = @transform_4, window_bounds = array<i64: 1, 64>}, {pipeline_mode = #tpu.pipeline_mode<synchronous>, transform_indices = @transform_5, window_bounds = array<i64: 64, 64>}, {pipeline_mode = #tpu.pipeline_mode<synchronous>, transform_indices = @transform_6, window_bounds = array<i64: 1, 64>}, {pipeline_mode = #tpu.pipeline_mode<synchronous>, transform_indices = @transform_7, window_bounds = array<i64: 64, 2>}, {pipeline_mode = #tpu.pipeline_mode<synchronous>, transform_indices = @transform_8, window_bounds = array<i64: 1, 2>}, {transform_indices = @transform_9, window_bounds = array<i64: 1, 1, 8>}]} {
    %c0 = arith.constant 0 : index
    %c0_0 = arith.constant 0 : index
    %0 = vector.load %arg1[%c0, %c0_0] : memref<8x12xf32, #tpu.memory_space<vmem>>, vector<8x12xf32>
    %c0_1 = arith.constant 0 : index
    %c0_2 = arith.constant 0 : index
    %1 = vector.load %arg2[%c0_1, %c0_2] : memref<8x4xf32, #tpu.memory_space<vmem>>, vector<8x4xf32>
    %c0_3 = arith.constant 0 : index
    %c0_4 = arith.constant 0 : index
    %2 = vector.load %arg3[%c0_3, %c0_4] : memref<12x64xf32, #tpu.memory_space<vmem>>, vector<12x64xf32>
    %cst = arith.constant dense<0.000000e+00> : vector<8x64xf32>
    %3 = tpu.matmul %0, %2, %cst {dimension_numbers = #tpu.dot_dimension_numbers<[1], [0], [0], [1], [0, 0, 1, 1], [], []>} : vector<8x12xf32>, vector<12x64xf32>, vector<8x64xf32> -> vector<8x64xf32>
    %c0_5 = arith.constant 0 : index
    %c0_6 = arith.constant 0 : index
    %4 = vector.load %arg4[%c0_5, %c0_6] : memref<4x64xf32, #tpu.memory_space<vmem>>, vector<4x64xf32>
    %cst_7 = arith.constant dense<0.000000e+00> : vector<8x64xf32>
    %5 = tpu.matmul %1, %4, %cst_7 {dimension_numbers = #tpu.dot_dimension_numbers<[1], [0], [0], [1], [0, 0, 1, 1], [], []>} : vector<8x4xf32>, vector<4x64xf32>, vector<8x64xf32> -> vector<8x64xf32>
    %6 = arith.addf %3, %5 : vector<8x64xf32>
    %c0_8 = arith.constant 0 : index
    %c0_9 = arith.constant 0 : index
    %7 = vector.load %arg5[%c0_8, %c0_9] : memref<1x64xf32, #tpu.memory_space<vmem>>, vector<1x64xf32>
    %8 = vector.broadcast %7 : vector<1x64xf32> to vector<8x64xf32>
    %9 = arith.addf %6, %8 : vector<8x64xf32>
    %cst_10 = arith.constant 0.000000e+00 : f32
    %10 = vector.broadcast %cst_10 : f32 to vector<8x64xf32>
    %11 = arith.maximumf %9, %10 : vector<8x64xf32>
    %c0_11 = arith.constant 0 : index
    %c0_12 = arith.constant 0 : index
    %12 = vector.load %arg7[%c0_11, %c0_12] : memref<1x64xf32, #tpu.memory_space<vmem>>, vector<1x64xf32>
    %c0_13 = arith.constant 0 : index
    %c0_14 = arith.constant 0 : index
    %13 = vector.load %arg8[%c0_13, %c0_14] : memref<64x2xf32, #tpu.memory_space<vmem>>, vector<64x2xf32>
    %c0_15 = arith.constant 0 : index
    %c0_16 = arith.constant 0 : index
    %14 = vector.load %arg6[%c0_15, %c0_16] : memref<64x64xf32, #tpu.memory_space<vmem>>, vector<64x64xf32>
    %cst_17 = arith.constant dense<0.000000e+00> : vector<8x64xf32>
    %15 = tpu.matmul %11, %14, %cst_17 {dimension_numbers = #tpu.dot_dimension_numbers<[1], [0], [0], [1], [0, 0, 1, 1], [], []>} : vector<8x64xf32>, vector<64x64xf32>, vector<8x64xf32> -> vector<8x64xf32>
    %16 = vector.broadcast %12 : vector<1x64xf32> to vector<8x64xf32>
    %17 = arith.addf %15, %16 : vector<8x64xf32>
    %cst_18 = arith.constant 0.000000e+00 : f32
    %18 = vector.broadcast %cst_18 : f32 to vector<8x64xf32>
    %19 = arith.maximumf %17, %18 : vector<8x64xf32>
    %cst_19 = arith.constant dense<0.000000e+00> : vector<8x2xf32>
    %20 = tpu.matmul %19, %13, %cst_19 {dimension_numbers = #tpu.dot_dimension_numbers<[1], [0], [0], [1], [0, 0, 1, 1], [], []>} : vector<8x64xf32>, vector<64x2xf32>, vector<8x2xf32> -> vector<8x2xf32>
    %c0_20 = arith.constant 0 : index
    %c0_21 = arith.constant 0 : index
    %21 = vector.load %arg9[%c0_20, %c0_21] : memref<1x2xf32, #tpu.memory_space<vmem>>, vector<1x2xf32>
    %22 = vector.broadcast %21 : vector<1x2xf32> to vector<8x2xf32>
    %23 = arith.addf %20, %22 : vector<8x2xf32>
    %24 = tpu.transpose %23, [1, 0] : vector<8x2xf32> -> vector<2x8xf32>
    %25 = vector.extract_strided_slice %24 {offsets = [0, 0], sizes = [1, 8], strides = [1, 1]} : vector<2x8xf32> to vector<1x8xf32>
    %26 = vector.extract_strided_slice %24 {offsets = [1, 0], sizes = [1, 8], strides = [1, 1]} : vector<2x8xf32> to vector<1x8xf32>
    %27 = arith.minimumf %25, %26 : vector<1x8xf32>
    %c0_22 = arith.constant 0 : index
    %c0_23 = arith.constant 0 : index
    %c0_24 = arith.constant 0 : index
    %28 = vector.load %arg10[%c0_22, %c0_23, %c0_24] : memref<1x1x8xf32, #tpu.memory_space<vmem>>, vector<1x1x8xf32>
    %29 = vector.shape_cast %28 : vector<1x1x8xf32> to vector<1x8xf32>
    %30 = vector.shape_cast %27 : vector<1x8xf32> to vector<1x1x8xf32>
    tpu.vector_store %arg10[%c0_22, %c0_23, %c0_24], %30 {strides = array<i32>} : memref<1x1x8xf32, #tpu.memory_space<vmem>>, vector<1x1x8xf32>,
    return
  }
  func.func @transform_0(%arg0: i32) -> (i32, i32) {
    %c0_i32 = arith.constant 0 : i32
    %c0_i32_0 = arith.constant 0 : i32
    return %arg0, %c0_i32 : i32, i32
  }
  func.func @transform_1(%arg0: i32) -> (i32, i32) {
    %c0_i32 = arith.constant 0 : i32
    %c0_i32_0 = arith.constant 0 : i32
    return %arg0, %c0_i32 : i32, i32
  }
  func.func @transform_2(%arg0: i32) -> (i32, i32) {
    %c0_i32 = arith.constant 0 : i32
    %c0_i32_0 = arith.constant 0 : i32
    %c0_i32_1 = arith.constant 0 : i32
    return %c0_i32, %c0_i32_0 : i32, i32
  }
  func.func @transform_3(%arg0: i32) -> (i32, i32) {
    %c0_i32 = arith.constant 0 : i32
    %c0_i32_0 = arith.constant 0 : i32
    %c0_i32_1 = arith.constant 0 : i32
    return %c0_i32, %c0_i32_0 : i32, i32
  }
  func.func @transform_4(%arg0: i32) -> (i32, i32) {
    %c0_i32 = arith.constant 0 : i32
    %c0_i32_0 = arith.constant 0 : i32
    %c0_i32_1 = arith.constant 0 : i32
    return %c0_i32, %c0_i32_0 : i32, i32
  }
  func.func @transform_5(%arg0: i32) -> (i32, i32) {
    %c0_i32 = arith.constant 0 : i32
    %c0_i32_0 = arith.constant 0 : i32
    %c0_i32_1 = arith.constant 0 : i32
    return %c0_i32, %c0_i32_0 : i32, i32
  }
  func.func @transform_6(%arg0: i32) -> (i32, i32) {
    %c0_i32 = arith.constant 0 : i32
    %c0_i32_0 = arith.constant 0 : i32
    %c0_i32_1 = arith.constant 0 : i32
    return %c0_i32, %c0_i32_0 : i32, i32
  }
  func.func @transform_7(%arg0: i32) -> (i32, i32) {
    %c0_i32 = arith.constant 0 : i32
    %c0_i32_0 = arith.constant 0 : i32
    %c0_i32_1 = arith.constant 0 : i32
    return %c0_i32, %c0_i32_0 : i32, i32
  }
  func.func @transform_8(%arg0: i32) -> (i32, i32) {
    %c0_i32 = arith.constant 0 : i32
    %c0_i32_0 = arith.constant 0 : i32
    %c0_i32_1 = arith.constant 0 : i32
    return %c0_i32, %c0_i32_0 : i32, i32
  }
  func.func @transform_9(%arg0: i32) -> (i32, i32, i32) {
    %c0_i32 = arith.constant 0 : i32
    %c0_i32_0 = arith.constant 0 : i32
    %c0_i32_1 = arith.constant 0 : i32
    return %arg0, %c0_i32, %c0_i32_0 : i32, i32, i32
  }
}

</mosaic_0001>

<bundles_post_ra>
// kernel: tpu_custom_call.1
= control target key start
LH: loop header
LB: loop body
LE: loop exit
PB: predicated region body
PF: predicated region fallthrough
CT: control target
= control target key end

     0   :  { %vm42_vm0 = vcmask 1043456   ;;  %v571_v2 = vmov 0.0|0.0   ;;  %v572_v3 = vmov 0.0   ;;  %vm38_vm1 = vcmask 31744   ;;  %s714_s0 = inlined_call_operand.vmem [shape: f32[8,12], index: 0, kind: input, shape index: {}]   ;;  %s715_s1 = inlined_call_operand.vmem [shape: f32[8,4], index: 1, kind: input, shape index: {}]   ;;  %s716_s2 = inlined_call_operand.vmem [shape: f32[12,64], index: 2, kind: input, shape index: {}]   ;;  %s717_s3 = inlined_call_operand.vmem [shape: f32[4,64], index: 3, kind: input, shape index: {}]   ;;  %s718_s4 = inlined_call_operand.vmem [shape: f32[1,64], index: 4, kind: input, shape index: {}]   ;;  %s719_s5 = inlined_call_operand.vmem [shape: f32[64,64], index: 5, kind: input, shape index: {}]   ;;  %s720_s6 = inlined_call_operand.vmem [shape: f32[1,64], index: 6, kind: input, shape index: {}]   ;;  %s721_s7 = inlined_call_operand.vmem [shape: f32[64,2], index: 7, kind: input, shape index: {}]   ;;  %s722_s8 = inlined_call_operand.vmem [shape: f32[1,2], index: 8, kind: input, shape index: {}]   ;;  %s723_s9 = inlined_call_operand.hbm [shape: f32[1,1,8], index: 9, kind: output, shape index: {}]  }
   0x1   :  { %v35_v0 = vld [vmem:[%s716_s2] sm:$0xff]  ;;  %v36_v1 = vld [vmem:[%s716_s2 + $0x8] sm:$0xf]  ;;  %514 = vmatprep.subr.bf16.mxu1 %v571_v2  ;;  %464 = vmatprep.subr.mxu0 %v572_v3  ;;  %vm573_vm2 = vmmov 1   ;;  %vm574_vm4 = vmmov 0   ;;  %vm116_vm5 = vcmask 97280  }
   0x2   :  { %v515_v4 = vpack.c.bf16 %v36_v1, %v35_v0  ;;  %v37_v5 = vld [vmem:[%s717_s3] sm:$0xf]  ;;  %vm516_vm3 = vmpackc.low %vm42_vm0, %vm573_vm2  ;;  %466 = vmatprep.mubr.msk.f32.mxu0 %vm574_vm4, %v572_v3  ;;  %v212_v9 = vld [vmem:[%s719_s5 + $0x8] sm:$0xff]  ;;  %473 = vmatprep.mubr.msk.f32.mxu1 %vm574_vm4, %v572_v3 }
   0x3   :  { %v34_v6 = vld [vmem:[%s715_s1] sm:$0xff]  ;;  %465 = vmatpush3.msk.msra.mxu0 %vm42_vm0, %v37_v5  ;;  %v213_v10 = vld [vmem:[%s719_s5 + $0x10] sm:$0xff]  ;;  %v214_v11 = vld [vmem:[%s719_s5 + $0x18] sm:$0xff] }
   0x4   :  { %v33_v7 = vld [vmem:[%s714_s0] sm:$0xff]  ;;  %517 = vmatpush3.bf16.msk.msra.mxu1 %vm516_vm3, %v515_v4  ;;  %467 = vmatmul.mubr.msk.f32.vlgmr.msra.gmra.mrb[0].mxu0 %vm38_vm1, %v34_v6 }
   0x5   :  { %v211_v8 = vld [vmem:[%s719_s5] sm:$0xff]  ;;  %518 = vmatprep.subr.bf16.mxu0 %v571_v2 }
   0x6   :  { %v519_v12 = vpack.c.bf16 %v212_v9, %v211_v8 }
   0x7   :  { %14 = vsyncpa [#allocation3], 0  ;;  %492 = vmatprep.mubr.msk.f32.mxu0 %vm574_vm4, %v572_v3  ;;  %530 = vmatprep.subr.bf16.mxu1 %v571_v2  ;;  %v522_v13 = vpack.c.bf16 %v214_v11, %v213_v10  ;;  %v215_v14 = vld [vmem:[%s719_s5 + $0x20] sm:$0xff]  ;;  %v216_v15 = vld [vmem:[%s719_s5 + $0x28] sm:$0xff]  ;;  %vm225_vm6 = vcmask 523264   ;;  %vm416_vm7 = vcmask 57344  }
   0x8   :  { %474 = vmatmul.mubr.msk.f32.vlgmr.msra.gmra.mrb[0].mxu1 %vm116_vm5, %v33_v7  ;;  %520 = vmatpush3.bf16.msra.mxu0 %v519_v12  ;;  %v525_v16 = vpack.c.bf16 %v216_v15, %v215_v14  ;;  %v217_v17 = vld [vmem:[%s719_s5 + $0x30] sm:$0xff]  ;;  %v218_v18 = vld [vmem:[%s719_s5 + $0x38] sm:$0xff]  ;;  %v203_v20 = vld [vmem:[%s721_s7] sm:$0xff] }
   0x9   :  { %521 = vmatprep.subr.bf16.mxu0 %v571_v2  ;;  %511 = vmatprep.mubr.msk.f32.mxu1 %vm574_vm4, %v572_v3  ;;  %v528_v19 = vpack.c.bf16 %v218_v18, %v217_v17  ;;  %v204_v21 = vld [vmem:[%s721_s7 + $0x8] sm:$0xff]  ;;  %v205_v22 = vld [vmem:[%s721_s7 + $0x10] sm:$0xff]  ;;  %v206_v24 = vld [vmem:[%s721_s7 + $0x18] sm:$0xff] }
   0xa   :  { %v531_v23 = vpack.c.bf16 %v204_v21, %v203_v20  ;;  %v534_v25 = vpack.c.bf16 %v206_v24, %v205_v22  ;;  %v207_v26 = vld [vmem:[%s721_s7 + $0x20] sm:$0xff]  ;;  %v208_v27 = vld [vmem:[%s721_s7 + $0x28] sm:$0xff]  ;;  %v209_v37 = vld [vmem:[%s721_s7 + $0x30] sm:$0xff] }
   0xb   :  { %v537_v28 = vpack.c.bf16 %v208_v27, %v207_v26  ;;  %v436_v32 = vld [vmem:[%s718_s4] ss:$0 sm:$0xff]  ;;  %v210_v38 = vld [vmem:[%s721_s7 + $0x38] sm:$0xff]  ;;  %s575_s7 = smov [#allocation2]  }
   0xc   :  { %523 = vmatpush3.bf16.msra.mxu0 %v522_v13  ;;  %532 = vmatpush3.bf16.msra.mxu1 %v531_v23  ;;  %v540_v39 = vpack.c.bf16 %v210_v38, %v209_v37  ;;  %v437_v40 = vld [vmem:[%s720_s6] ss:$0 sm:$0xff]  ;;  %s424_s26 = sshll.u32 %s575_s7, 4  ;;  %s425_s26 = int_to_ptr.vmem [resolvable:$true] %s424_s26 }
   0xd   :  { %524 = vmatprep.subr.bf16.mxu0 %v571_v2  ;;  %533 = vmatprep.subr.bf16.mxu1 %v571_v2  ;;  %v439_v45 = vld [vmem:[%s722_s8] ss:$0 sm:$0xff]  ;;  %s547_s6 = scalar_lea.vmem %s425_s26, 16  ;;  %s551_s27 = scalar_lea.vmem %s425_s26, 32 }
   0xe   :  { %p548_p0 = scmp.ne.s32.totalorder %s425_s26, %s547_s6  ;;  %p552_p1 = scmp.lt.s32.totalorder %s425_s26, %s425_s26 }
   0xf   :  { %p553_p2 = scmp.lt.s32.totalorder %s551_s27, %s547_s6 }
  0x10   :  { %526 = vmatpush3.bf16.msra.mxu0 %v525_v16  ;;  %535 = vmatpush3.bf16.msra.mxu1 %v534_v25 }
  0x11   :  { %527 = vmatprep.subr.bf16.mxu0 %v571_v2  ;;  %536 = vmatprep.subr.bf16.mxu1 %v571_v2  ;;  %p554_p3 = por %p553_p2, %p552_p1 }
  0x13   :  { %p555_p4 = pnand %p554_p3, %p548_p0 }
  0x14   :  { %529 = vmatpush3.bf16.msra.mxu0 %v528_v19  ;;  %538 = vmatpush3.bf16.msra.mxu1 %v537_v28 }
  0x15   :  { %539 = vmatprep.subr.bf16.mxu1 %v571_v2 }
  0x18   :  { %541 = vmatpush3.bf16.msra.mxu1 %v540_v39 }
  0xd7   :  { %v112_v29 = vpop.f32.mrb[0].mxu0 }
  0xd8   :  { %v468_v30 = vpop.f32.mrb[1].mxu0 }
  0xdb   :  { %v189_v31 = vpop.f32.mrb[0].mxu1 }
  0xdc   :  { %v190_v33 = vadd.f32 %v189_v31, %v112_v29  ;;  %v475_v34 = vpop.f32.mrb[1].mxu1 }
  0xde   :  { %v200_v35 = vadd.f32 %v436_v32, %v190_v33 }
  0xe0   :  { %v201_v36 = vmax.f32 %v200_v35, 0.0 }
  0xe2   :  { %493 = vmatmul.mubr.msk.f32.vlgmr.msra.gmra.mrb[2].mxu0 %vm225_vm6, %v201_v36 }
 0x1b5   :  { %v295_v41 = vpop.f32.mrb[2].mxu0 }
 0x1b6   :  { %v296_v42 = vadd.f32 %v437_v40, %v295_v41  ;;  %v494_v43 = vpop.f32.mrb[3].mxu0 }
 0x1b8   :  { %v299_v44 = vmax.f32 %v296_v42, 0.0 }
 0x1ba   :  { %512 = vmatmul.mubr.msk.f32.vlgmr.msra.gmra.mrb[2].mxu1 %vm225_vm6, %v299_v44 }
 0x28d   :  { %v376_v46 = vpop.f32.mrb[2].mxu1 }
 0x28e   :  { %v513_v47 = vpop.f32.mrb[3].mxu1  ;;  %v377_v48 = vadd.f32 %v439_v45, %v376_v46 }
 0x290   :  { %380 = vxpose.xlu0.b32.start.end [1/1] (short) (narrow) %v377_v48, 8 }
 0x310   :  { %v396_v49 = vpop.trf.xlu0 }
 0x311   :  { %v413_v50 = vrot.slane %v396_v49, 1 }
 0x313   :  { %v415_v51 = vmin.f32 %v396_v49, %v413_v50 }
 0x315   :  { %417 = vst.msk [vmem:[#allocation2] sm:$0x1] %vm416_vm7, %v415_v51 }
 0x316   :  { %558 = shalt.err (!%p555_p4)
}
 0x317   :  { %s559_s29 = scalar_lea.hbm %s723_s9, 16 }
 0x318   :  { %p560_p5 = scmp.ne.s32.totalorder %s723_s9, %s559_s29  ;;  %p563_p6 = scmp.lt.u32.totalorder %s559_s29, %s723_s9 }
 0x31a   :  { %p565_p7 = pnand %p563_p6, %p560_p5 }
 0x31c   :  { %568 = shalt.err (!%p565_p7)
}
 0x31d   :  { %427 = dma.vmem_to_hbm [thread:$0]  %s425_s26, 16, %s723_s9, [#allocation3]  }
 0x31e   :  { %569 = dma.done.wait [#allocation3], 16  }
 0x31f   :  { %570 = vsyncadd [#allocation3], 4294967280 }
 0x320   :  { %431 = vsyncpa [#allocation3], 1 }

// kernel: tpu_custom_call.1
= control target key start
LH: loop header
LB: loop body
LE: loop exit
PB: predicated region body
PF: predicated region fallthrough
CT: control target
= control target key end

     0   :  { %vm42_vm0 = vcmask 1043456   ;;  %v571_v2 = vmov 0.0|0.0   ;;  %v572_v3 = vmov 0.0   ;;  %vm38_vm1 = vcmask 31744   ;;  %s714_s0 = inlined_call_operand.vmem [shape: f32[8,12], index: 0, kind: input, shape index: {}]   ;;  %s715_s1 = inlined_call_operand.vmem [shape: f32[8,4], index: 1, kind: input, shape index: {}]   ;;  %s716_s2 = inlined_call_operand.vmem [shape: f32[12,64], index: 2, kind: input, shape index: {}]   ;;  %s717_s3 = inlined_call_operand.vmem [shape: f32[4,64], index: 3, kind: input, shape index: {}]   ;;  %s718_s4 = inlined_call_operand.vmem [shape: f32[1,64], index: 4, kind: input, shape index: {}]   ;;  %s719_s5 = inlined_call_operand.vmem [shape: f32[64,64], index: 5, kind: input, shape index: {}]   ;;  %s720_s6 = inlined_call_operand.vmem [shape: f32[1,64], index: 6, kind: input, shape index: {}]   ;;  %s721_s7 = inlined_call_operand.vmem [shape: f32[64,2], index: 7, kind: input, shape index: {}]   ;;  %s722_s8 = inlined_call_operand.vmem [shape: f32[1,2], index: 8, kind: input, shape index: {}]   ;;  %s723_s9 = inlined_call_operand.hbm [shape: f32[1,1,8], index: 9, kind: output, shape index: {}]  }
   0x1   :  { %v35_v0 = vld [vmem:[%s716_s2] sm:$0xff]  ;;  %v36_v1 = vld [vmem:[%s716_s2 + $0x8] sm:$0xf]  ;;  %514 = vmatprep.subr.bf16.mxu1 %v571_v2  ;;  %464 = vmatprep.subr.mxu0 %v572_v3  ;;  %vm573_vm2 = vmmov 1   ;;  %vm574_vm4 = vmmov 0   ;;  %vm116_vm5 = vcmask 97280  }
   0x2   :  { %v515_v4 = vpack.c.bf16 %v36_v1, %v35_v0  ;;  %v37_v5 = vld [vmem:[%s717_s3] sm:$0xf]  ;;  %vm516_vm3 = vmpackc.low %vm42_vm0, %vm573_vm2  ;;  %466 = vmatprep.mubr.msk.f32.mxu0 %vm574_vm4, %v572_v3  ;;  %v212_v9 = vld [vmem:[%s719_s5 + $0x8] sm:$0xff]  ;;  %473 = vmatprep.mubr.msk.f32.mxu1 %vm574_vm4, %v572_v3 }
   0x3   :  { %v34_v6 = vld [vmem:[%s715_s1] sm:$0xff]  ;;  %465 = vmatpush3.msk.msra.mxu0 %vm42_vm0, %v37_v5  ;;  %v213_v10 = vld [vmem:[%s719_s5 + $0x10] sm:$0xff]  ;;  %v214_v11 = vld [vmem:[%s719_s5 + $0x18] sm:$0xff] }
   0x4   :  { %v33_v7 = vld [vmem:[%s714_s0] sm:$0xff]  ;;  %517 = vmatpush3.bf16.msk.msra.mxu1 %vm516_vm3, %v515_v4  ;;  %467 = vmatmul.mubr.msk.f32.vlgmr.msra.gmra.mrb[0].mxu0 %vm38_vm1, %v34_v6 }
   0x5   :  { %v211_v8 = vld [vmem:[%s719_s5] sm:$0xff]  ;;  %518 = vmatprep.subr.bf16.mxu0 %v571_v2 }
   0x6   :  { %v519_v12 = vpack.c.bf16 %v212_v9, %v211_v8 }
   0x7   :  { %14 = vsyncpa [#allocation3], 0  ;;  %492 = vmatprep.mubr.msk.f32.mxu0 %vm574_vm4, %v572_v3  ;;  %530 = vmatprep.subr.bf16.mxu1 %v571_v2  ;;  %v522_v13 = vpack.c.bf16 %v214_v11, %v213_v10  ;;  %v215_v14 = vld [vmem:[%s719_s5 + $0x20] sm:$0xff]  ;;  %v216_v15 = vld [vmem:[%s719_s5 + $0x28] sm:$0xff]  ;;  %vm225_vm6 = vcmask 523264   ;;  %vm416_vm7 = vcmask 57344  }
   0x8   :  { %474 = vmatmul.mubr.msk.f32.vlgmr.msra.gmra.mrb[0].mxu1 %vm116_vm5, %v33_v7  ;;  %520 = vmatpush3.bf16.msra.mxu0 %v519_v12  ;;  %v525_v16 = vpack.c.bf16 %v216_v15, %v215_v14  ;;  %v217_v17 = vld [vmem:[%s719_s5 + $0x30] sm:$0xff]  ;;  %v218_v18 = vld [vmem:[%s719_s5 + $0x38] sm:$0xff]  ;;  %v203_v20 = vld [vmem:[%s721_s7] sm:$0xff] }
   0x9   :  { %521 = vmatprep.subr.bf16.mxu0 %v571_v2  ;;  %511 = vmatprep.mubr.msk.f32.mxu1 %vm574_vm4, %v572_v3  ;;  %v528_v19 = vpack.c.bf16 %v218_v18, %v217_v17  ;;  %v204_v21 = vld [vmem:[%s721_s7 + $0x8] sm:$0xff]  ;;  %v205_v22 = vld [vmem:[%s721_s7 + $0x10] sm:$0xff]  ;;  %v206_v24 = vld [vmem:[%s721_s7 + $0x18] sm:$0xff] }
   0xa   :  { %v531_v23 = vpack.c.bf16 %v204_v21, %v203_v20  ;;  %v534_v25 = vpack.c.bf16 %v206_v24, %v205_v22  ;;  %v207_v26 = vld [vmem:[%s721_s7 + $0x20] sm:$0xff]  ;;  %v208_v27 = vld [vmem:[%s721_s7 + $0x28] sm:$0xff]  ;;  %v209_v37 = vld [vmem:[%s721_s7 + $0x30] sm:$0xff] }
   0xb   :  { %v537_v28 = vpack.c.bf16 %v208_v27, %v207_v26  ;;  %v436_v32 = vld [vmem:[%s718_s4] ss:$0 sm:$0xff]  ;;  %v210_v38 = vld [vmem:[%s721_s7 + $0x38] sm:$0xff]  ;;  %s575_s7 = smov [#allocation2]  }
   0xc   :  { %523 = vmatpush3.bf16.msra.mxu0 %v522_v13  ;;  %532 = vmatpush3.bf16.msra.mxu1 %v531_v23  ;;  %v540_v39 = vpack.c.bf16 %v210_v38, %v209_v37  ;;  %v437_v40 = vld [vmem:[%s720_s6] ss:$0 sm:$0xff]  ;;  %s424_s26 = sshll.u32 %s575_s7, 4  ;;  %s425_s26 = int_to_ptr.vmem [resolvable:$true] %s424_s26 }
   0xd   :  { %524 = vmatprep.subr.bf16.mxu0 %v571_v2  ;;  %533 = vmatprep.subr.bf16.mxu1 %v571_v2  ;;  %v439_v45 = vld [vmem:[%s722_s8] ss:$0 sm:$0xff]  ;;  %s547_s6 = scalar_lea.vmem %s425_s26, 16  ;;  %s551_s27 = scalar_lea.vmem %s425_s26, 32 }
   0xe   :  { %p548_p0 = scmp.ne.s32.totalorder %s425_s26, %s547_s6  ;;  %p552_p1 = scmp.lt.s32.totalorder %s425_s26, %s425_s26 }
   0xf   :  { %p553_p2 = scmp.lt.s32.totalorder %s551_s27, %s547_s6 }
  0x10   :  { %526 = vmatpush3.bf16.msra.mxu0 %v525_v16  ;;  %535 = vmatpush3.bf16.msra.mxu1 %v534_v25 }
  0x11   :  { %527 = vmatprep.subr.bf16.mxu0 %v571_v2  ;;  %536 = vmatprep.subr.bf16.mxu1 %v571_v2  ;;  %p554_p3 = por %p553_p2, %p552_p1 }
  0x13   :  { %p555_p4 = pnand %p554_p3, %p548_p0 }
  0x14   :  { %529 = vmatpush3.bf16.msra.mxu0 %v528_v19  ;;  %538 = vmatpush3.bf16.msra.mxu1 %v537_v28 }
  0x15   :  { %539 = vmatprep.subr.bf16.mxu1 %v571_v2 }
  0x18   :  { %541 = vmatpush3.bf16.msra.mxu1 %v540_v39 }
  0xd7   :  { %v112_v29 = vpop.f32.mrb[0].mxu0 }
  0xd8   :  { %v468_v30 = vpop.f32.mrb[1].mxu0 }
  0xdb   :  { %v189_v31 = vpop.f32.mrb[0].mxu1 }
  0xdc   :  { %v190_v33 = vadd.f32 %v189_v31, %v112_v29  ;;  %v475_v34 = vpop.f32.mrb[1].mxu1 }
  0xde   :  { %v200_v35 = vadd.f32 %v436_v32, %v190_v33 }
  0xe0   :  { %v201_v36 = vmax.f32 %v200_v35, 0.0 }
  0xe2   :  { %493 = vmatmul.mubr.msk.f32.vlgmr.msra.gmra.mrb[2].mxu0 %vm225_vm6, %v201_v36 }
 0x1b5   :  { %v295_v41 = vpop.f32.mrb[2].mxu0 }
 0x1b6   :  { %v296_v42 = vadd.f32 %v437_v40, %v295_v41  ;;  %v494_v43 = vpop.f32.mrb[3].mxu0 }
 0x1b8   :  { %v299_v44 = vmax.f32 %v296_v42, 0.0 }
 0x1ba   :  { %512 = vmatmul.mubr.msk.f32.vlgmr.msra.gmra.mrb[2].mxu1 %vm225_vm6, %v299_v44 }
 0x28d   :  { %v376_v46 = vpop.f32.mrb[2].mxu1 }
 0x28e   :  { %v513_v47 = vpop.f32.mrb[3].mxu1  ;;  %v377_v48 = vadd.f32 %v439_v45, %v376_v46 }
 0x290   :  { %380 = vxpose.xlu0.b32.start.end [1/1] (short) (narrow) %v377_v48, 8 }
 0x310   :  { %v396_v49 = vpop.trf.xlu0 }
 0x311   :  { %v413_v50 = vrot.slane %v396_v49, 1 }
 0x313   :  { %v415_v51 = vmin.f32 %v396_v49, %v413_v50 }
 0x315   :  { %417 = vst.msk [vmem:[#allocation2] sm:$0x1] %vm416_vm7, %v415_v51 }
 0x316   :  { %558 = shalt.err (!%p555_p4)
}
 0x317   :  { %s559_s29 = scalar_lea.hbm %s723_s9, 16 }
 0x318   :  { %p560_p5 = scmp.ne.s32.totalorder %s723_s9, %s559_s29  ;;  %p563_p6 = scmp.lt.u32.totalorder %s559_s29, %s723_s9 }
 0x31a   :  { %p565_p7 = pnand %p563_p6, %p560_p5 }
 0x31c   :  { %568 = shalt.err (!%p565_p7)
}
 0x31d   :  { %427 = dma.vmem_to_hbm [thread:$0]  %s425_s26, 16, %s723_s9, [#allocation3]  }
 0x31e   :  { %569 = dma.done.wait [#allocation3], 16  }
 0x31f   :  { %570 = vsyncadd [#allocation3], 4294967280 }
 0x320   :  { %431 = vsyncpa [#allocation3], 1 }

</bundles_post_ra>
